<compile_context>
chip_gen: v7x
topology: tpu7x:2x2x1
jax: 0.10.0
libtpu: 0.0.40
codegen_flags: <defaults>
</compile_context>

<pallas_src>
import functools

import jax
import jax.numpy as jnp
from jax.experimental import pallas as pl
from jax.experimental.pallas import tpu as pltpu


# ------------------------------ Pallas kernel -------------------------------

def _make_ca_kernel(inv_hw, split_pool):
    """Builds the fused channel-attention kernel.

    Per grid step the kernel sees:
      alpha_ref : (1,)         SMEM  PReLU slope (nn.PReLU() single parameter)
      x_ref     : (B, C, HWp)  VMEM  B images; channels on sublanes, spatial on lanes
      w1t_ref   : (C, Cr)      VMEM  first 1x1 conv weight, transposed
      b1_ref    : (1, Cr)
      w2_ref    : (C, Cr)            second 1x1 conv weight
      b2_ref    : (C, 1)
      o_ref     : (B, C, HWp)
    """

    def kernel(alpha_ref, x_ref, w1t_ref, b1_ref, w2_ref, b2_ref, o_ref):
        x = x_ref[...]                                               # native dtype, no f32 copy

        # AdaptiveAvgPool2d(1): mean over the spatial (lane) axis -> (B, C, 1) f32.
        if split_pool:
            half = x.shape[-1] // 2
            xs = (x[..., :half].astype(jnp.float32)
                  + x[..., half:].astype(jnp.float32))               # VPU add, halves XLU work
            pooled = jnp.sum(xs, axis=-1, keepdims=True) * inv_hw
        else:
            pooled = jnp.sum(x, axis=-1, keepdims=True,
                             dtype=jnp.float32) * inv_hw

        # conv_du[0]: 1x1 conv C -> Cr (+bias).  h[b, j] = sum_c W1[j, c] * p[b, c]
        w1t = w1t_ref[...][None, :, :]                               # hoisted broadcast (1, C, Cr)
        h = jnp.sum(w1t * pooled, axis=1, keepdims=True) + b1_ref[...][None]     # (B, 1, Cr)

        # PReLU with a single learnable slope.
        alpha = alpha_ref[0]
        h = jnp.where(h >= 0.0, h, alpha * h)

        # conv_du[2]: 1x1 conv Cr -> C (+bias).  y[b, c] = sum_j W2[c, j] * h[b, j]
        w2 = w2_ref[...][None, :, :]                                 # hoisted broadcast (1, C, Cr)
        y = jnp.sum(w2 * h, axis=-1, keepdims=True) + b2_ref[...][None]          # (B, C, 1)
        y = jax.nn.sigmoid(y)

        # x * y : channel-wise rescale, broadcast over the lane/spatial axis.
        o_ref[...] = (x * y.astype(x.dtype)).astype(o_ref.dtype)

    return kernel


# ---------------------------- batch-tile selection ---------------------------

def _pick_batch_tile(N, C, HWp, itemsize, vmem_budget_bytes=8 << 20):
    """Largest divisor of N whose pipelined footprint fits the VMEM budget.

    Live bytes ~ 2 buffers x (in + out) x B*C*HWp*itemsize.  Prefer a B that
    leaves an even grid length (both v7x TensorCores busy) unless that would
    shrink the tile by more than 2x.
    """
    per_image = 4 * C * HWp * itemsize
    max_b = max(1, vmem_budget_bytes // max(per_image, 1))
    divisors = [b for b in range(1, N + 1) if N % b == 0 and b <= max_b]
    if not divisors:
        return 1
    best = divisors[-1]
    even_grid = [b for b in divisors if (N // b) % 2 == 0]
    if even_grid and even_grid[-1] * 2 >= best:
        best = even_grid[-1]
    return best


# -------------------------------- Wrapper ------------------------------------

def prepare_params(params):
    """One-time parameter massaging — keep this OUT of the per-call hot path."""
    Cr, C = params["w1"].shape
    return {
        "w1t": jnp.asarray(params["w1"], jnp.float32).T,              # (C, Cr)
        "b1": jnp.asarray(params["b1"], jnp.float32).reshape(1, Cr),  # (1, Cr)
        "w2": jnp.asarray(params["w2"], jnp.float32),                 # (C, Cr)
        "b2": jnp.asarray(params["b2"], jnp.float32).reshape(C, 1),   # (C, 1)
        "alpha": jnp.asarray(params["alpha"], jnp.float32).reshape(1),
    }


@jax.jit
def ca_layer(x_nchw, prepped):
    """x_nchw: (N, C, H, W); prepped: output of prepare_params."""
    N, C, H, W = x_nchw.shape
    Cr = prepped["w1t"].shape[1]
    HW = H * W

    # Lane-dense spatial axis: pad H*W up to a multiple of 128 so loads/stores
    # are unmasked.  The pool divides by the true HW (padded zeros don't change
    # the sum) and padded output columns are discarded below.
    HWp = ((HW + 127) // 128) * 128
    x = x_nchw.reshape(N, C, HW)                                     # contiguous, no data move
    if HWp != HW:
        x = jnp.pad(x, ((0, 0), (0, 0), (0, HWp - HW)))

    itemsize = jnp.dtype(x.dtype).itemsize
    B = _pick_batch_tile(N, C, HWp, itemsize)
    grid = (N // B,)
    split_pool = (HWp % 256 == 0)
    kernel = _make_ca_kernel(1.0 / HW, split_pool)

    flops = N * C * (3 * HW + 4 * Cr)                                # pool + MLP + rescale
    bytes_accessed = 2 * N * C * HWp * itemsize + (2 * C * Cr + C + Cr + 1) * 4

    out = pl.pallas_call(
        kernel,
        out_shape=jax.ShapeDtypeStruct((N, C, HWp), x.dtype),
        grid=grid,
        in_specs=[
            pl.BlockSpec(memory_space=pltpu.MemorySpace.SMEM),        # alpha
            pl.BlockSpec((B, C, HWp), lambda n: (n, 0, 0)),           # x
            pl.BlockSpec((C, Cr), lambda n: (0, 0)),                  # w1^T
            pl.BlockSpec((1, Cr), lambda n: (0, 0)),                  # b1
            pl.BlockSpec((C, Cr), lambda n: (0, 0)),                  # w2
            pl.BlockSpec((C, 1), lambda n: (0, 0)),                   # b2
        ],
        out_specs=pl.BlockSpec((B, C, HWp), lambda n: (n, 0, 0)),
        compiler_params=pltpu.CompilerParams(
            dimension_semantics=("parallel",)),                       # v7x: both TCs
        cost_estimate=pl.CostEstimate(
            flops=flops, transcendentals=N * C, bytes_accessed=bytes_accessed),
    )(prepped["alpha"], x, prepped["w1t"], prepped["b1"],
      prepped["w2"], prepped["b2"])

    if HWp != HW:
        out = out[..., :HW]
    return out.reshape(N, C, H, W)


# ---------------------- deterministic parameter init ------------------------

def init_params(key, channel, reduction=24):
    cr = max(channel // reduction, 1)
    k1, k2, k3, k4 = jax.random.split(key, 4)
    return {
        "w1": jax.random.normal(k1, (cr, channel), jnp.float32) * 0.1,
        "b1": jax.random.normal(k2, (cr,), jnp.float32) * 0.1,
        "w2": jax.random.normal(k3, (channel, cr), jnp.float32) * 0.1,
        "b2": jax.random.normal(k4, (channel,), jnp.float32) * 0.1,
        "alpha": jnp.array(0.25, jnp.float32),    # nn.PReLU() default init
    }


# ---------------------------- pure-JAX reference -----------------------------

def reference(x, params):
    # x: (N, C, H, W)
    pooled = jnp.mean(x, axis=(2, 3))                                # (N, C)
    h = pooled @ params["w1"].T + params["b1"]                       # (N, Cr)
    h = jnp.where(h >= 0.0, h, params["alpha"] * h)                  # PReLU
    y = jax.nn.sigmoid(h @ params["w2"].T + params["b2"])            # (N, C)
    return x * y[:, :, None, None]


# --------------------------------- main --------------------------------------

if __name__ == "__main__":
    # channel must be >= reduction (24) so the hidden width channel//24 >= 1.
    N, C, H, W = 8, 48, 16, 16
    key = jax.random.PRNGKey(0)
    kx, kp = jax.random.split(key)
    x = jax.random.normal(kx, (N, C, H, W), jnp.float32)
    params = init_params(kp, C, reduction=24)
    prepped = prepare_params(params)                                  # one-time, out of hot path

    out = ca_layer(x, prepped)
    out = jax.block_until_ready(out)
    assert out.shape == (N, C, H, W)

    ref = reference(x, params)
    max_err = float(jnp.max(jnp.abs(out - ref)))
    assert jnp.allclose(out, ref, atol=1e-5, rtol=1e-5), max_err

    print("KERNEL_OK")
</pallas_src>

<mosaic_0001>
module attributes {stable_mosaic.version = 11 : i64} {
  func.func @kernel(%arg0: i32, %arg1: memref<1xf32, #tpu.memory_space<smem>>, %arg2: memref<4x48x256xf32, #tpu.memory_space<vmem>>, %arg3: memref<48x2xf32, #tpu.memory_space<vmem>>, %arg4: memref<1x2xf32, #tpu.memory_space<vmem>>, %arg5: memref<48x2xf32, #tpu.memory_space<vmem>>, %arg6: memref<48x1xf32, #tpu.memory_space<vmem>>, %arg7: memref<4x48x256xf32, #tpu.memory_space<vmem>>) attributes {dimension_semantics = [#tpu.dimension_semantics<parallel>], iteration_bounds = array<i64: 2>, scalar_prefetch = 0 : i64, scratch_operands = 0 : i64, tpu.core_type = #tpu.core_type<tc>, window_params = [{transform_indices = @transform_0, window_bounds = array<i64: 1>}, {transform_indices = @transform_1, window_bounds = array<i64: 4, 48, 256>}, {pipeline_mode = #tpu.pipeline_mode<synchronous>, transform_indices = @transform_2, window_bounds = array<i64: 48, 2>}, {pipeline_mode = #tpu.pipeline_mode<synchronous>, transform_indices = @transform_3, window_bounds = array<i64: 1, 2>}, {pipeline_mode = #tpu.pipeline_mode<synchronous>, transform_indices = @transform_4, window_bounds = array<i64: 48, 2>}, {pipeline_mode = #tpu.pipeline_mode<synchronous>, transform_indices = @transform_5, window_bounds = array<i64: 48, 1>}, {transform_indices = @transform_6, window_bounds = array<i64: 4, 48, 256>}]} {
    %c0 = arith.constant 0 : index
    %c0_0 = arith.constant 0 : index
    %c0_1 = arith.constant 0 : index
    %0 = vector.load %arg2[%c0, %c0_0, %c0_1] : memref<4x48x256xf32, #tpu.memory_space<vmem>>, vector<4x48x256xf32>
    %1 = vector.extract_strided_slice %0 {offsets = [0, 0, 0], sizes = [4, 48, 128], strides = [1, 1, 1]} : vector<4x48x256xf32> to vector<4x48x128xf32>
    %2 = vector.extract_strided_slice %0 {offsets = [0, 0, 128], sizes = [4, 48, 128], strides = [1, 1, 1]} : vector<4x48x256xf32> to vector<4x48x128xf32>
    %3 = arith.addf %1, %2 : vector<4x48x128xf32>
    %cst = arith.constant dense<0.000000e+00> : vector<4x48xf32>
    %4 = vector.multi_reduction <add>, %3, %cst [2] : vector<4x48x128xf32> to vector<4x48xf32>
    %5 = vector.shape_cast %4 : vector<4x48xf32> to vector<4x48x1xf32>
    %cst_2 = arith.constant 3.906250e-03 : f32
    %6 = vector.broadcast %cst_2 : f32 to vector<4x48x1xf32>
    %7 = arith.mulf %5, %6 : vector<4x48x1xf32>
    %c0_3 = arith.constant 0 : index
    %c0_4 = arith.constant 0 : index
    %8 = vector.load %arg3[%c0_3, %c0_4] : memref<48x2xf32, #tpu.memory_space<vmem>>, vector<48x2xf32>
    %9 = vector.shape_cast %8 : vector<48x2xf32> to vector<1x48x2xf32>
    %10 = vector.broadcast %9 : vector<1x48x2xf32> to vector<4x48x2xf32>
    %11 = vector.broadcast %7 : vector<4x48x1xf32> to vector<4x48x2xf32>
    %12 = arith.mulf %10, %11 : vector<4x48x2xf32>
    %cst_5 = arith.constant dense<0.000000e+00> : vector<4x2xf32>
    %13 = vector.multi_reduction <add>, %12, %cst_5 [1] : vector<4x48x2xf32> to vector<4x2xf32>
    %14 = vector.shape_cast %13 : vector<4x2xf32> to vector<4x1x2xf32>
    %c0_6 = arith.constant 0 : index
    %c0_7 = arith.constant 0 : index
    %15 = vector.load %arg4[%c0_6, %c0_7] : memref<1x2xf32, #tpu.memory_space<vmem>>, vector<1x2xf32>
    %16 = vector.shape_cast %15 : vector<1x2xf32> to vector<1x1x2xf32>
    %17 = vector.broadcast %16 : vector<1x1x2xf32> to vector<4x1x2xf32>
    %18 = arith.addf %14, %17 : vector<4x1x2xf32>
    %c0_8 = arith.constant 0 : index
    %19 = memref.load %arg1[%c0_8] : memref<1xf32, #tpu.memory_space<smem>>
    %cst_9 = arith.constant 0.000000e+00 : f32
    %20 = vector.broadcast %cst_9 : f32 to vector<4x1x2xf32>
    %21 = arith.cmpf oge, %18, %20 : vector<4x1x2xf32>
    %22 = vector.broadcast %19 : f32 to vector<4x1x2xf32>
    %23 = arith.mulf %22, %18 : vector<4x1x2xf32>
    %24 = arith.select %21, %18, %23 : vector<4x1x2xi1>, vector<4x1x2xf32>
    %c0_10 = arith.constant 0 : index
    %c0_11 = arith.constant 0 : index
    %25 = vector.load %arg5[%c0_10, %c0_11] : memref<48x2xf32, #tpu.memory_space<vmem>>, vector<48x2xf32>
    %26 = vector.shape_cast %25 : vector<48x2xf32> to vector<1x48x2xf32>
    %27 = vector.broadcast %26 : vector<1x48x2xf32> to vector<4x48x2xf32>
    %28 = vector.broadcast %24 : vector<4x1x2xf32> to vector<4x48x2xf32>
    %29 = arith.mulf %27, %28 : vector<4x48x2xf32>
    %cst_12 = arith.constant dense<0.000000e+00> : vector<4x48xf32>
    %30 = vector.multi_reduction <add>, %29, %cst_12 [2] : vector<4x48x2xf32> to vector<4x48xf32>
    %31 = vector.shape_cast %30 : vector<4x48xf32> to vector<4x48x1xf32>
    %c0_13 = arith.constant 0 : index
    %c0_14 = arith.constant 0 : index
    %32 = vector.load %arg6[%c0_13, %c0_14] : memref<48x1xf32, #tpu.memory_space<vmem>>, vector<48x1xf32>
    %33 = vector.shape_cast %32 : vector<48x1xf32> to vector<1x48x1xf32>
    %34 = vector.broadcast %33 : vector<1x48x1xf32> to vector<4x48x1xf32>
    %35 = arith.addf %31, %34 : vector<4x48x1xf32>
    %36 = arith.negf %35 : vector<4x48x1xf32>
    %37 = math.exp %36 : vector<4x48x1xf32>
    %cst_15 = arith.constant 1.000000e+00 : f32
    %38 = vector.broadcast %cst_15 : f32 to vector<4x48x1xf32>
    %39 = arith.addf %38, %37 : vector<4x48x1xf32>
    %40 = arith.divf %38, %39 : vector<4x48x1xf32>
    %41 = vector.broadcast %40 : vector<4x48x1xf32> to vector<4x48x256xf32>
    %42 = arith.mulf %0, %41 : vector<4x48x256xf32>
    %c0_16 = arith.constant 0 : index
    %c0_17 = arith.constant 0 : index
    %c0_18 = arith.constant 0 : index
    %43 = vector.load %arg7[%c0_16, %c0_17, %c0_18] : memref<4x48x256xf32, #tpu.memory_space<vmem>>, vector<4x48x256xf32>
    tpu.vector_store %arg7[%c0_16, %c0_17, %c0_18], %42 {strides = array<i32>} : memref<4x48x256xf32, #tpu.memory_space<vmem>>, vector<4x48x256xf32>,
    return
  }
  func.func @transform_0(%arg0: i32) -> i32 {
    %c0_i32 = arith.constant 0 : i32
    %c0_i32_0 = arith.constant 0 : i32
    return %c0_i32 : i32
  }
  func.func @transform_1(%arg0: i32) -> (i32, i32, i32) {
    %c0_i32 = arith.constant 0 : i32
    %c0_i32_0 = arith.constant 0 : i32
    %c0_i32_1 = arith.constant 0 : i32
    return %arg0, %c0_i32, %c0_i32_0 : i32, i32, i32
  }
  func.func @transform_2(%arg0: i32) -> (i32, i32) {
    %c0_i32 = arith.constant 0 : i32
    %c0_i32_0 = arith.constant 0 : i32
    %c0_i32_1 = arith.constant 0 : i32
    return %c0_i32, %c0_i32_0 : i32, i32
  }
  func.func @transform_3(%arg0: i32) -> (i32, i32) {
    %c0_i32 = arith.constant 0 : i32
    %c0_i32_0 = arith.constant 0 : i32
    %c0_i32_1 = arith.constant 0 : i32
    return %c0_i32, %c0_i32_0 : i32, i32
  }
  func.func @transform_4(%arg0: i32) -> (i32, i32) {
    %c0_i32 = arith.constant 0 : i32
    %c0_i32_0 = arith.constant 0 : i32
    %c0_i32_1 = arith.constant 0 : i32
    return %c0_i32, %c0_i32_0 : i32, i32
  }
  func.func @transform_5(%arg0: i32) -> (i32, i32) {
    %c0_i32 = arith.constant 0 : i32
    %c0_i32_0 = arith.constant 0 : i32
    %c0_i32_1 = arith.constant 0 : i32
    return %c0_i32, %c0_i32_0 : i32, i32
  }
  func.func @transform_6(%arg0: i32) -> (i32, i32, i32) {
    %c0_i32 = arith.constant 0 : i32
    %c0_i32_0 = arith.constant 0 : i32
    %c0_i32_1 = arith.constant 0 : i32
    return %arg0, %c0_i32, %c0_i32_0 : i32, i32, i32
  }
}

</mosaic_0001>

<bundles_post_ra>
// kernel: ca_layer.1
= control target key start
LH: loop header
LB: loop body
LE: loop exit
PB: predicated region body
PF: predicated region fallthrough
CT: control target
= control target key end

     0   :  { %s1327_s23 = smov 0   ;;  %s1700_s0 = inlined_call_operand.<no memory space> [shape: f32[1], index: 0, kind: input, shape index: {}]   ;;  %s1701_s1 = inlined_call_operand.vmem [shape: f32[8,48,256], index: 1, kind: input, shape index: {}]   ;;  %s1702_s2 = inlined_call_operand.vmem [shape: f32[48,2], index: 2, kind: input, shape index: {}]   ;;  %s1703_s3 = inlined_call_operand.vmem [shape: f32[1,2], index: 3, kind: input, shape index: {}]   ;;  %s1704_s4 = inlined_call_operand.vmem [shape: f32[48,2], index: 4, kind: input, shape index: {}]   ;;  %s1705_s5 = inlined_call_operand.vmem [shape: f32[48,1], index: 5, kind: input, shape index: {}]   ;;  %s1706_s6 = inlined_call_operand.vmem [shape: f32[8,48,256], index: 6, kind: output, shape index: {}]  }
   0x1   :  { %11 = sst [smem:[#allocation2]] %s1700_s0 }
   0x2 LB: > { %s1089_s24 = sadd.s32 4294967295, %s1286_s23   ;;  %p1093_p0 = scmp.ge.s32.totalorder %s1286_s23, 1  ;;  %s1286_s23 = sphi %s1327_s23, %s17_s23  }
   0x3   : > { %p215_p1 = scmp.lt.s32.totalorder %s1286_s23, 3 }
   0x5   : > { %p216_p2 = pnand %p1093_p0, %p215_p1 }
   0x6   : > { %s1094_s25 = sshll.u32 (!%p216_p2), %s1089_s24, 2  ;;  %vm435_vm0 = vcmask (!%p216_p2), 15360   ;;  %s509_s17 = sld [smem:[#allocation2]] (!%p216_p2) }
   0x7   : > { %219 = sbr.rel (%p216_p2) target bundleno = 587 (0x24b), region = 44  ;;  %p248_p3 = scmp.lt.s32.totalorder (!%p216_p2), %s1094_s25, 7 }
   0xe   : > { %s1708_s25 = smov (!%p248_p3, %s1094_s25), 7 }
   0xf   : > { %s1124_s0 = smul.u32 96, %s1708_s25 }
  0x11   : > { %s1343_s28 = scalar_lea.vmem %s1701_s1, %s1124_s0  ;;  %s1599_s27 = scalar_lea.vmem %s1706_s6, %s1124_s0 }
  0x12   : > { %v273_v0 = vld [vmem:[%s1343_s28 + $0x60] sm:$0xff]  ;;  %v274_v1 = vld [vmem:[%s1343_s28 + $0x68] sm:$0xff]  ;;  %v275_v5 = vld [vmem:[%s1343_s28 + $0x70] sm:$0xff] }
  0x13   : > { %v261_v2 = vld [vmem:[%s1343_s28] sm:$0xff]  ;;  %v315_v3 = vadd.f32 %v274_v1, %v273_v0  ;;  %v262_v4 = vld [vmem:[%s1343_s28 + $0x8] sm:$0xff]  ;;  %v276_v6 = vld [vmem:[%s1343_s28 + $0x78] sm:$0xff] }
  0x14   : > { %v309_v7 = vadd.f32 %v262_v4, %v261_v2  ;;  %v263_v8 = vld [vmem:[%s1343_s28 + $0x10] sm:$0xff]  ;;  %v264_v9 = vld [vmem:[%s1343_s28 + $0x18] sm:$0xff]  ;;  %v316_v10 = vadd.f32 %v276_v6, %v275_v5  ;;  %v285_v12 = vld [vmem:[%s1343_s28 + $0xc0] sm:$0xff] }
  0x15   : > { %345 = vadd.xlane.f32.xlu1 %v315_v3  ;;  %v310_v11 = vadd.f32 %v264_v9, %v263_v8  ;;  %v286_v13 = vld [vmem:[%s1343_s28 + $0xc8] sm:$0xff]  ;;  %v265_v14 = vld [vmem:[%s1343_s28 + $0x20] sm:$0xff]  ;;  %v287_v20 = vld [vmem:[%s1343_s28 + $0xd0] sm:$0xff] }
  0x16   : > { %333 = vadd.xlane.f32.xlu0 %v309_v7  ;;  %v266_v15 = vld [vmem:[%s1343_s28 + $0x28] sm:$0xff]  ;;  %v321_v16 = vadd.f32 %v286_v13, %v285_v12  ;;  %v277_v18 = vld [vmem:[%s1343_s28 + $0x80] sm:$0xff]  ;;  %v288_v21 = vld [vmem:[%s1343_s28 + $0xd8] sm:$0xff] }
  0x17   : > { %v311_v17 = vadd.f32 %v266_v15, %v265_v14  ;;  %v278_v19 = vld [vmem:[%s1343_s28 + $0x88] sm:$0xff]  ;;  %v322_v23 = vadd.f32 %v288_v21, %v287_v20  ;;  %v299_v24 = vld [vmem:[%s1343_s28 + $0x130] sm:$0xff]  ;;  %v300_v25 = vld [vmem:[%s1343_s28 + $0x138] sm:$0xff] }
  0x18   : > { %v317_v22 = vadd.f32 %v278_v19, %v277_v18  ;;  %v297_v26 = vld [vmem:[%s1343_s28 + $0x120] sm:$0xff]  ;;  %v298_v27 = vld [vmem:[%s1343_s28 + $0x128] sm:$0xff]  ;;  %v328_v28 = vadd.f32 %v300_v25, %v299_v24  ;;  %v267_v32 = vld [vmem:[%s1343_s28 + $0x30] sm:$0xff] }
  0x19   : > { %347 = vadd.xlane.f32.xlu1 %v316_v10  ;;  %v327_v29 = vadd.f32 %v298_v27, %v297_v26  ;;  %v289_v30 = vld [vmem:[%s1343_s28 + $0xe0] sm:$0xff]  ;;  %v290_v31 = vld [vmem:[%s1343_s28 + $0xe8] sm:$0xff]  ;;  %v268_v33 = vld [vmem:[%s1343_s28 + $0x38] sm:$0xff] }
  0x1a   : > { %335 = vadd.xlane.f32.xlu0 %v310_v11  ;;  %v323_v34 = vadd.f32 %v290_v31, %v289_v30  ;;  %v312_v35 = vadd.f32 %v268_v33, %v267_v32  ;;  %v301_v36 = vld [vmem:[%s1343_s28 + $0x140] sm:$0xff]  ;;  %v302_v37 = vld [vmem:[%s1343_s28 + $0x148] sm:$0xff]  ;;  %v279_v38 = vld [vmem:[%s1343_s28 + $0x90] sm:$0xff] }
  0x1b   : > { %v280_v39 = vld [vmem:[%s1343_s28 + $0x98] sm:$0xff]  ;;  %v329_v40 = vadd.f32 %v302_v37, %v301_v36  ;;  %v291_v42 = vld [vmem:[%s1343_s28 + $0xf0] sm:$0xff]  ;;  %v269_v44 = vld [vmem:[%s1343_s28 + $0x40] sm:$0xff] }
  0x1c   : > { %v318_v41 = vadd.f32 %v280_v39, %v279_v38  ;;  %v292_v43 = vld [vmem:[%s1343_s28 + $0xf8] sm:$0xff]  ;;  %v270_v45 = vld [vmem:[%s1343_s28 + $0x48] sm:$0xff]  ;;  %v303_v48 = vld [vmem:[%s1343_s28 + $0x150] sm:$0xff] }
  0x1d   : > { %357 = vadd.xlane.f32.xlu1 %v321_v16  ;;  %v324_v46 = vadd.f32 %v292_v43, %v291_v42  ;;  %v313_v47 = vadd.f32 %v270_v45, %v269_v44  ;;  %v304_v49 = vld [vmem:[%s1343_s28 + $0x158] sm:$0xff]  ;;  %v281_v50 = vld [vmem:[%s1343_s28 + $0xa0] sm:$0xff]  ;;  %v282_v51 = vld [vmem:[%s1343_s28 + $0xa8] sm:$0xff] }
  0x1e   : > { %337 = vadd.xlane.f32.xlu0 %v311_v17  ;;  %v330_v52 = vadd.f32 %v304_v49, %v303_v48  ;;  %v319_v53 = vadd.f32 %v282_v51, %v281_v50  ;;  %v293_v54 = vld [vmem:[%s1343_s28 + $0x100] sm:$0xff]  ;;  %v294_v55 = vld [vmem:[%s1343_s28 + $0x108] sm:$0xff]  ;;  %v271_v56 = vld [vmem:[%s1343_s28 + $0x50] sm:$0xff] }
  0x1f   : > { %v272_v57 = vld [vmem:[%s1343_s28 + $0x58] sm:$0xff]  ;;  %v325_v58 = vadd.f32 %v294_v55, %v293_v54  ;;  %v305_v60 = vld [vmem:[%s1343_s28 + $0x160] sm:$0xff]  ;;  %v306_v61 = vld [vmem:[%s1343_s28 + $0x168] sm:$0xff] }
  0x20   : > { %v314_v59 = vadd.f32 %v272_v57, %v271_v56  ;;  %v283_v62 = vld [vmem:[%s1343_s28 + $0xb0] sm:$0xff]  ;;  %v284_v63 = vld [vmem:[%s1343_s28 + $0xb8] sm:$0xff]  ;;  %v331_v0 = vadd.f32 %v306_v61, %v305_v60  ;;  %v406_v27 = vld [vmem:[%s1702_s2 + $0x8] sm:$0xff] }
  0x21   : > { %349 = vadd.xlane.f32.xlu1 %v317_v22  ;;  %v320_v1 = vadd.f32 %v284_v63, %v283_v62  ;;  %v307_v2 = vld [vmem:[%s1343_s28 + $0x170] sm:$0xff]  ;;  %v308_v3 = vld [vmem:[%s1343_s28 + $0x178] sm:$0xff]  ;;  %v405_v22 = vld [vmem:[%s1702_s2] sm:$0xff] }
  0x22   : > { %359 = vadd.xlane.f32.xlu0 %v322_v23  ;;  %v295_v4 = vld [vmem:[%s1343_s28 + $0x110] sm:$0xff]  ;;  %v296_v5 = vld [vmem:[%s1343_s28 + $0x118] sm:$0xff]  ;;  %v332_v6 = vadd.f32 %v308_v3, %v307_v2  ;;  %v1410_v48 = vld [vmem:[%s1702_s2 + $0x20] sm:$0xff] }
  0x23   : > { %v326_v7 = vadd.f32 %v296_v5, %v295_v4  ;;  %v407_v33 = vld [vmem:[%s1702_s2 + $0x10] sm:$0xff] }
  0x25   : > { %371 = vadd.xlane.f32.xlu1 %v328_v28 }
  0x26   : > { %369 = vadd.xlane.f32.xlu0 %v327_v29 }
  0x29   : > { %361 = vadd.xlane.f32.xlu1 %v323_v34 }
  0x2a   : > { %339 = vadd.xlane.f32.xlu0 %v312_v35 }
  0x2d   : > { %373 = vadd.xlane.f32.xlu1 %v329_v40  ;;  %v408_v40 = vld [vmem:[%s1702_s2 + $0x18] sm:$0xff] }
  0x2e   : > { %351 = vadd.xlane.f32.xlu0 %v318_v41 }
  0x31   : > { %363 = vadd.xlane.f32.xlu1 %v324_v46 }
  0x32   : > { %341 = vadd.xlane.f32.xlu0 %v313_v47 }
  0x35   : > { %375 = vadd.xlane.f32.xlu1 %v330_v52 }
  0x36   : > { %353 = vadd.xlane.f32.xlu0 %v319_v53 }
  0x39   : > { %365 = vadd.xlane.f32.xlu1 %v325_v58 }
  0x3a   : > { %343 = vadd.xlane.f32.xlu0 %v314_v59 }
  0x3d   : > { %377 = vadd.xlane.f32.xlu1 %v331_v0 }
  0x3e   : > { %355 = vadd.xlane.f32.xlu0 %v320_v1 }
  0x41   : > { %379 = vadd.xlane.f32.xlu1 %v332_v6 }
  0x42   : > { %367 = vadd.xlane.f32.xlu0 %v326_v7 }
  0xa2   : > { %v346_v8 = vpop.xlane.xlu1 %345 }
  0xa3   : > { %v334_v9 = vpop.xlane.xlu0 %333  ;;  %v387_v19 = vmul.f32 0.00390625, %v346_v8 }
  0xa4   : > { %v381_v26 = vmul.f32 0.00390625, %v334_v9 }
  0xa5   : > { %v417_v25 = vmul.f32 %v405_v22, %v387_v19 }
  0xa6   : > { %v348_v10 = vpop.xlane.xlu1 %347  ;;  %v411_v39 = vmul.f32 %v405_v22, %v381_v26 }
  0xa7   : > { %v336_v11 = vpop.xlane.xlu0 %335  ;;  %v388_v21 = vmul.f32 0.00390625, %v348_v10  ;;  %v453_v38 = vsel %vm435_vm0, %v417_v25, 0.0 }
  0xa8   : > { %v382_v23 = vmul.f32 0.00390625, %v336_v11  ;;  %v436_v54 = vsel %vm435_vm0, %v411_v39, 0.0 }
  0xa9   : > { %v418_v29 = vmul.f32 %v406_v27, %v388_v21 }
  0xaa   : > { %v358_v12 = vpop.xlane.xlu1 %357  ;;  %v412_v35 = vmul.f32 %v406_v27, %v382_v23 }
  0xab   : > { %v338_v13 = vpop.xlane.xlu0 %337  ;;  %v393_v32 = vmul.f32 0.00390625, %v358_v12  ;;  %v454_v42 = vsel %vm435_vm0, %v418_v29, 0.0  ;;  %v410_v12 = vld [vmem:[%s1702_s2 + $0x28] sm:$0xff] }
  0xac   : > { %v383_v30 = vmul.f32 0.00390625, %v338_v13  ;;  %v437_v49 = vsel %vm435_vm0, %v412_v35, 0.0  ;;  %v455_v55 = vadd.f32 %v454_v42, %v453_v38 }
  0xad   : > { %v423_v46 = vmul.f32 %v405_v22, %v393_v32  ;;  %v438_v63 = vadd.f32 %v437_v49, %v436_v54 }
  0xae   : > { %v350_v14 = vpop.xlane.xlu1 %349  ;;  %v413_v43 = vmul.f32 %v407_v33, %v383_v30 }
  0xaf   : > { %v360_v15 = vpop.xlane.xlu0 %359  ;;  %v389_v31 = vmul.f32 0.00390625, %v350_v14  ;;  %v470_v0 = vsel %vm435_vm0, %v423_v46, 0.0 }
  0xb0   : > { %v394_v34 = vmul.f32 0.00390625, %v360_v15  ;;  %v439_v59 = vsel %vm435_vm0, %v413_v43, 0.0 }
  0xb1   : > { %v419_v44 = vmul.f32 %v407_v33, %v389_v31  ;;  %v440_v8 = vadd.f32 %v439_v59, %v438_v63 }
  0xb2   : > { %v372_v16 = vpop.xlane.xlu1 %371  ;;  %v424_v47 = vmul.f32 %v406_v27, %v394_v34 }
  0xb3   : > { %v370_v17 = vpop.xlane.xlu0 %369  ;;  %v400_v50 = vmul.f32 0.00390625, %v372_v16  ;;  %v456_v60 = vsel %vm435_vm0, %v419_v44, 0.0 }
  0xb4   : > { %v399_v56 = vmul.f32 0.00390625, %v370_v17  ;;  %v471_v1 = vsel %vm435_vm0, %v424_v47, 0.0  ;;  %v457_v9 = vadd.f32 %v456_v60, %v455_v55 }
  0xb5   : > { %v430_v3 = vmul.f32 %v406_v27, %v400_v50 }
  0xb6   : > { %v362_v18 = vpop.xlane.xlu1 %361  ;;  %v429_v10 = vmul.f32 %v405_v22, %v399_v56 }
  0xb7   : > { %v340_v20 = vpop.xlane.xlu0 %339  ;;  %v395_v57 = vmul.f32 0.00390625, %v362_v18  ;;  %v472_v18 = vadd.f32 %v471_v1, %v470_v0  ;;  %v488_v23 = vsel %vm435_vm0, %v430_v3, 0.0  ;;  %v529_v1 = vlaneseq }
  0xb8   : > { %v384_v36 = vmul.f32 0.00390625, %v340_v20  ;;  %v487_v27 = vsel %vm435_vm0, %v429_v10, 0.0 }
  0xb9   : > { %v425_v11 = vmul.f32 %v407_v33, %v395_v57 }
  0xba   : > { %v374_v24 = vpop.xlane.xlu1 %373  ;;  %v414_v51 = vmul.f32 %v408_v40, %v384_v36 }
  0xbb   : > { %v352_v28 = vpop.xlane.xlu0 %351  ;;  %v401_v5 = vmul.f32 0.00390625, %v374_v24 }
  0xbc   : > { %v390_v52 = vmul.f32 0.00390625, %v352_v28  ;;  %v441_v4 = vsel %vm435_vm0, %v414_v51, 0.0  ;;  %v473_v28 = vsel %vm435_vm0, %v425_v11, 0.0  ;;  %v1444_v11 = vld [vmem:[%s1703_s3] sm:$0x1] }
  0xbd   : > { %v442_v19 = vadd.f32 %v441_v4, %v440_v8  ;;  %v431_v24 = vmul.f32 %v407_v33, %v401_v5  ;;  %v474_v42 = vadd.f32 %v473_v28, %v472_v18  ;;  %v1456_v28 = vld [vmem:[%s1704_s4 + $0x8] sm:$0xff] }
  0xbe   : > { %v364_v37 = vpop.xlane.xlu1 %363  ;;  %v420_v6 = vmul.f32 %v408_v40, %v390_v52 }
  0xbf   : > { %v342_v41 = vpop.xlane.xlu0 %341  ;;  %v396_v2 = vmul.f32 0.00390625, %v364_v37  ;;  %v490_v43 = vsel %vm435_vm0, %v431_v24, 0.0 }
  0xc0   : > { %v385_v45 = vmul.f32 0.00390625, %v342_v41  ;;  %v458_v22 = vsel %vm435_vm0, %v420_v6, 0.0  ;;  %v489_v41 = vadd.f32 %v488_v23, %v487_v27 }
  0xc1   : > { %v426_v20 = vmul.f32 %v408_v40, %v396_v2  ;;  %v459_v37 = vadd.f32 %v458_v22, %v457_v9 }
  0xc2   : > { %v376_v53 = vpop.xlane.xlu1 %375  ;;  %v415_v61 = vmul.f32 %v1410_v48, %v385_v45  ;;  %v491_v59 = vadd.f32 %v490_v43, %v489_v41 }
  0xc3   : > { %v354_v58 = vpop.xlane.xlu0 %353  ;;  %v402_v21 = vmul.f32 0.00390625, %v376_v53  ;;  %v475_v33 = vsel %vm435_vm0, %v426_v20, 0.0 }
  0xc4   : > { %v391_v62 = vmul.f32 0.00390625, %v354_v58  ;;  %v443_v14 = vsel %vm435_vm0, %v415_v61, 0.0  ;;  %v476_v52 = vadd.f32 %v475_v33, %v474_v42  ;;  %v1475_v33 = vld [vmem:[%s1704_s4 + $0x10] sm:$0xff] }
  0xc5   : > { %v444_v29 = vadd.f32 %v443_v14, %v442_v19  ;;  %v432_v38 = vmul.f32 %v408_v40, %v402_v21 }
  0xc6   : > { %v366_v7 = vpop.xlane.xlu1 %365  ;;  %v421_v15 = vmul.f32 %v1410_v48, %v391_v62 }
  0xc7   : > { %v344_v13 = vpop.xlane.xlu0 %343  ;;  %v397_v16 = vmul.f32 0.00390625, %v366_v7  ;;  %v492_v40 = vsel %vm435_vm0, %v432_v38, 0.0 }
  0xc8   : > { %v386_v17 = vmul.f32 0.00390625, %v344_v13  ;;  %v460_v32 = vsel %vm435_vm0, %v421_v15, 0.0  ;;  %v493_v0 = vadd.f32 %v492_v40, %v491_v59 }
  0xc9   : > { %v427_v34 = vmul.f32 %v1410_v48, %v397_v16  ;;  %v461_v46 = vadd.f32 %v460_v32, %v459_v37 }
  0xca   : > { %v416_v25 = vmul.f32 %v410_v12, %v386_v17  ;;  %v378_v26 = vpop.xlane.xlu1 %377  ;;  %v1446_v17 = vstv %s509_s17 }
  0xcb   : > { %v403_v30 = vmul.f32 0.00390625, %v378_v26  ;;  %v356_v31 = vpop.xlane.xlu0 %355  ;;  %v477_v53 = vsel %vm435_vm0, %v427_v34, 0.0 }
  0xcc   : > { %v445_v35 = vsel %vm435_vm0, %v416_v25, 0.0  ;;  %v392_v36 = vmul.f32 0.00390625, %v356_v31  ;;  %v478_v61 = vadd.f32 %v477_v53, %v476_v52 }
  0xcd   : > { %v446_v39 = vadd.f32 %v445_v35, %v444_v29  ;;  %v433_v49 = vmul.f32 %v1410_v48, %v403_v30  ;;  %v1461_v29 = vld [vmem:[%s1704_s4] sm:$0xff]  ;;  %v1468_v35 = vld [vmem:[%s1704_s4 + $0x18] sm:$0xff] }
  0xce   : > { %v422_v44 = vmul.f32 %v410_v12, %v392_v36  ;;  %v380_v45 = vpop.xlane.xlu1 %379 }
  0xcf   : > { %v447_v47 = vrot.slane %v446_v39, 4  ;;  %v404_v50 = vmul.f32 0.00390625, %v380_v45  ;;  %v368_v51 = vpop.xlane.xlu0 %367  ;;  %v494_v48 = vsel %vm435_vm0, %v433_v49, 0.0 }
  0xd0   : > { %v462_v54 = vsel %vm435_vm0, %v422_v44, 0.0  ;;  %v398_v55 = vmul.f32 0.00390625, %v368_v51  ;;  %v495_v7 = vadd.f32 %v494_v48, %v493_v0 }
  0xd1   : > { %v448_v56 = vadd.f32 %v447_v47, %v446_v39  ;;  %v463_v57 = vadd.f32 %v462_v54, %v461_v46  ;;  %v434_v58 = vmul.f32 %v410_v12, %v404_v50  ;;  %v1484_v46 = vld [vmem:[%s1704_s4 + $0x28] sm:$0xff]  ;;  %v1489_v47 = vld [vmem:[%s1704_s4 + $0x20] sm:$0xff] }
  0xd2   : > { %v428_v60 = vmul.f32 %v410_v12, %v398_v55  ;;  %v530_v12 = vshrl.u32 %v529_v1, 7 }
  0xd3   : > { %v449_v62 = vrot.slane %v448_v56, 2  ;;  %v464_v63 = vrot.slane %v463_v57, 4  ;;  %v496_v5 = vsel %vm435_vm0, %v434_v58, 0.0 }
  0xd4   : > { %v479_v2 = vsel %vm435_vm0, %v428_v60, 0.0  ;;  %v497_v13 = vadd.f32 %v496_v5, %v495_v7  ;;  %v1449_v21 = vsub.s32 0, %v530_v12 }
  0xd5   : > { %v450_v3 = vadd.f32 %v449_v62, %v448_v56  ;;  %v465_v4 = vadd.f32 %v464_v63, %v463_v57  ;;  %v480_v6 = vadd.f32 %v479_v2, %v478_v61 }
  0xd6   : > { %v498_v23 = vrot.slane %v497_v13, 4 }
  0xd7   : > { %v451_v8 = vrot.slane %v450_v3, 1  ;;  %v466_v9 = vrot.slane %v465_v4, 2  ;;  %v481_v10 = vrot.slane %v480_v6, 4 }
  0xd8   : > { %v499_v31 = vadd.f32 %v498_v23, %v497_v13 }
  0xd9   : > { %v452_v14 = vadd.f32 %v451_v8, %v450_v3  ;;  %v467_v15 = vadd.f32 %v466_v9, %v465_v4  ;;  %v482_v16 = vadd.f32 %v481_v10, %v480_v6 }
  0xda   : > { %v500_v38 = vrot.slane %v499_v31, 2 }
  0xdb   : > { %v505_v18 = vadd.f32 %v1444_v11, %v452_v14  ;;  %v468_v19 = vrot.slane %v467_v15, 1  ;;  %v483_v20 = vrot.slane %v482_v16, 2 }
  0xdc   : > { %v501_v52 = vadd.f32 %v500_v38, %v499_v31  ;;  %v1288_v38 = vmov 0  }
  0xdd   : > { %vm510_vm1 = vcmp.ge.f32.partialorder %v505_v18, 0.0  ;;  %v515_v24 = vmul.f32 %v1446_v17, %v505_v18  ;;  %v469_v22 = vadd.f32 %v468_v19, %v467_v15  ;;  %v484_v25 = vadd.f32 %v483_v20, %v482_v16  ;;  %1135 = vset.pattern.permute.xlu1 %v1288_v38  ;;  %1134 = vset.pattern.permute.xlu0 %v1288_v38 }
  0xde   : > { %v502_v57 = vrot.slane %v501_v52, 1 }
  0xdf   : > { %v519_v26 = vsel %vm510_vm1, %v505_v18, %v515_v24  ;;  %v506_v27 = vadd.f32 %v1444_v11, %v469_v22  ;;  %v485_v34 = vrot.slane %v484_v25, 1 }
  0xe0   : > { %v532_v30 = vrot.slane %v519_v26, %v1449_v21  ;;  %v503_v48 = vadd.f32 %v502_v57, %v501_v52 }
  0xe1   : > { %v516_v32 = vmul.f32 %v1446_v17, %v506_v27  ;;  %vm511_vm2 = vcmp.ge.f32.partialorder %v506_v27, 0.0  ;;  %v486_v43 = vadd.f32 %v485_v34, %v484_v25 }
  0xe2   : > { %v546_v36 = vmul.f32 %v532_v30, %v1456_v28  ;;  %v545_v37 = vmul.f32 %v532_v30, %v1461_v29  ;;  %v548_v41 = vmul.f32 %v532_v30, %v1468_v35  ;;  %v547_v45 = vmul.f32 %v532_v30, %v1475_v33 }
  0xe3   : > { %v520_v42 = vsel %vm511_vm2, %v506_v27, %v516_v32  ;;  %v550_v51 = vmul.f32 %v532_v30, %v1484_v46  ;;  %v507_v53 = vadd.f32 %v1444_v11, %v486_v43  ;;  %v549_v55 = vmul.f32 %v532_v30, %v1489_v47 }
  0xe4   : > { %v572_v39 = vsel %vm435_vm0, %v546_v36, 0.0  ;;  %v569_v44 = vsel %vm435_vm0, %v545_v37, 0.0  ;;  %v536_v49 = vrot.slane %v520_v42, %v1449_v21  ;;  %v578_v50 = vsel %vm435_vm0, %v548_v41, 0.0 }
  0xe5   : > { %573 = vadd.xlane.f32.xlu1 %v572_v39  ;;  %570 = vadd.xlane.f32.xlu0 %v569_v44  ;;  %v575_v54 = vsel %vm435_vm0, %v547_v45, 0.0  ;;  %v584_v40 = vsel %vm435_vm0, %v550_v51, 0.0  ;;  %v517_v58 = vmul.f32 %v1446_v17, %v507_v53  ;;  %v581_v59 = vsel %vm435_vm0, %v549_v55, 0.0  ;;  %v1548_v39 = vld [vmem:[%s1705_s5] sm:$0xff]  ;;  %v1555_v45 = vld [vmem:[%s1705_s5 + $0x18] sm:$0xff] }
  0xe6   : > { %v552_v56 = vmul.f32 %v536_v49, %v1456_v28  ;;  %v551_v60 = vmul.f32 %v536_v49, %v1461_v29  ;;  %vm512_vm3 = vcmp.ge.f32.partialorder %v507_v53, 0.0  ;;  %v554_v62 = vmul.f32 %v536_v49, %v1468_v35 }
  0xe7   : > { %v521_v63 = vsel %vm512_vm3, %v507_v53, %v517_v58  ;;  %v553_v1 = vmul.f32 %v536_v49, %v1475_v33  ;;  %v556_v4 = vmul.f32 %v536_v49, %v1484_v46  ;;  %v508_v5 = vadd.f32 %v1444_v11, %v503_v48 }
  0xe8   : > { %v590_v61 = vsel %vm435_vm0, %v552_v56, 0.0  ;;  %v587_v0 = vsel %vm435_vm0, %v551_v60, 0.0  ;;  %v540_v2 = vrot.slane %v521_v63, %v1449_v21  ;;  %v596_v3 = vsel %vm435_vm0, %v554_v62, 0.0 }
  0xe9   : > { %579 = vadd.xlane.f32.xlu1 %v578_v50  ;;  %576 = vadd.xlane.f32.xlu0 %v575_v54  ;;  %v593_v6 = vsel %vm435_vm0, %v553_v1, 0.0  ;;  %v555_v7 = vmul.f32 %v536_v49, %v1489_v47  ;;  %v602_v8 = vsel %vm435_vm0, %v556_v4, 0.0  ;;  %v518_v10 = vmul.f32 %v1446_v17, %v508_v5  ;;  %v1567_v54 = vld [vmem:[%s1705_s5 + $0x28] sm:$0xff] }
  0xea   : > { %v558_v9 = vmul.f32 %v540_v2, %v1456_v28  ;;  %v557_v13 = vmul.f32 %v540_v2, %v1461_v29  ;;  %vm513_vm4 = vcmp.ge.f32.partialorder %v508_v5, 0.0  ;;  %v560_v14 = vmul.f32 %v540_v2, %v1468_v35 }
  0xeb   : > { %v599_v12 = vsel %vm435_vm0, %v555_v7, 0.0  ;;  %v522_v15 = vsel %vm513_vm4, %v508_v5, %v518_v10  ;;  %v559_v18 = vmul.f32 %v540_v2, %v1475_v33  ;;  %v562_v20 = vmul.f32 %v540_v2, %v1484_v46 }
  0xec   : > { %v608_v11 = vsel %vm435_vm0, %v558_v9, 0.0  ;;  %v605_v16 = vsel %vm435_vm0, %v557_v13, 0.0  ;;  %v544_v17 = vrot.slane %v522_v15, %v1449_v21  ;;  %v614_v19 = vsel %vm435_vm0, %v560_v14, 0.0 }
  0xed   : > { %585 = vadd.xlane.f32.xlu1 %v584_v40  ;;  %582 = vadd.xlane.f32.xlu0 %v581_v59  ;;  %v611_v23 = vsel %vm435_vm0, %v559_v18, 0.0  ;;  %v561_v24 = vmul.f32 %v540_v2, %v1489_v47  ;;  %v620_v22 = vsel %vm435_vm0, %v562_v20, 0.0  ;;  %v1572_v40 = vld [vmem:[%s1705_s5 + $0x20] sm:$0xff] }
  0xee   : > { %v564_v25 = vmul.f32 %v544_v17, %v1456_v28  ;;  %v563_v27 = vmul.f32 %v544_v17, %v1461_v29  ;;  %v566_v30 = vmul.f32 %v544_v17, %v1468_v35  ;;  %v565_v32 = vmul.f32 %v544_v17, %v1475_v33  ;;  %v1543_v33 = vld [vmem:[%s1705_s5 + $0x8] sm:$0xff] }
  0xef   : > { %v617_v26 = vsel %vm435_vm0, %v561_v24, 0.0  ;;  %v568_v28 = vmul.f32 %v544_v17, %v1484_v46  ;;  %v567_v29 = vmul.f32 %v544_v17, %v1489_v47  ;;  %v1560_v47 = vld [vmem:[%s1705_s5 + $0x10] sm:$0xff] }
  0xf0   : > { %v626_v21 = vsel %vm435_vm0, %v564_v25, 0.0  ;;  %v623_v31 = vsel %vm435_vm0, %v563_v27, 0.0  ;;  %v632_v34 = vsel %vm435_vm0, %v566_v30, 0.0  ;;  %v629_v36 = vsel %vm435_vm0, %v565_v32, 0.0 }
  0xf1   : > { %591 = vadd.xlane.f32.xlu1 %v590_v61  ;;  %588 = vadd.xlane.f32.xlu0 %v587_v0  ;;  %v638_v37 = vsel %vm435_vm0, %v568_v28, 0.0  ;;  %v635_v35 = vsel %vm435_vm0, %v567_v29, 0.0 }
  0xf5   : > { %597 = vadd.xlane.f32.xlu1 %v596_v3  ;;  %594 = vadd.xlane.f32.xlu0 %v593_v6 }
  0xf9   : > { %603 = vadd.xlane.f32.xlu1 %v602_v8  ;;  %600 = vadd.xlane.f32.xlu0 %v599_v12 }
  0xfd   : > { %609 = vadd.xlane.f32.xlu1 %v608_v11  ;;  %606 = vadd.xlane.f32.xlu0 %v605_v16 }
 0x101   : > { %615 = vadd.xlane.f32.xlu1 %v614_v19  ;;  %612 = vadd.xlane.f32.xlu0 %v611_v23 }
 0x105   : > { %621 = vadd.xlane.f32.xlu1 %v620_v22  ;;  %618 = vadd.xlane.f32.xlu0 %v617_v26 }
 0x109   : > { %627 = vadd.xlane.f32.xlu1 %v626_v21  ;;  %624 = vadd.xlane.f32.xlu0 %v623_v31 }
 0x10d   : > { %633 = vadd.xlane.f32.xlu1 %v632_v34  ;;  %630 = vadd.xlane.f32.xlu0 %v629_v36 }
 0x111   : > { %639 = vadd.xlane.f32.xlu1 %v638_v37  ;;  %636 = vadd.xlane.f32.xlu0 %v635_v35 }
 0x172   : > { %v574_v41 = vpop.xlane.xlu1 %573  ;;  %v571_v43 = vpop.xlane.xlu0 %570 }
 0x173   : > { %v648_v42 = vadd.f32 %v1543_v33, %v574_v41  ;;  %v647_v44 = vadd.f32 %v1548_v39, %v571_v43 }
 0x175   : > { %v1099_v46 = vmul.f32 -1.442695, %v648_v42  ;;  %v1098_v49 = vmul.f32 -1.442695, %v647_v44 }
 0x176   : > { %v580_v50 = vpop.xlane.xlu1 %579  ;;  %v577_v52 = vpop.xlane.xlu0 %576 }
 0x177   : > { %1136 = vpow2.f32 %v1099_v46  ;;  %v650_v51 = vadd.f32 %v1555_v45, %v580_v50  ;;  %v649_v53 = vadd.f32 %v1560_v47, %v577_v52 }
 0x178   : > { %1138 = vpow2.f32 %v1098_v49 }
 0x179   : > { %v1101_v55 = vmul.f32 -1.442695, %v650_v51  ;;  %v1100_v56 = vmul.f32 -1.442695, %v649_v53 }
 0x17a   : > { %v586_v57 = vpop.xlane.xlu1 %585  ;;  %v583_v59 = vpop.xlane.xlu0 %582 }
 0x17b   : > { %1140 = vpow2.f32 %v1101_v55  ;;  %v652_v58 = vadd.f32 %v1567_v54, %v586_v57  ;;  %v651_v60 = vadd.f32 %v1572_v40, %v583_v59 }
 0x17c   : > { %1142 = vpow2.f32 %v1100_v56 }
 0x17d   : > { %v1103_v61 = vmul.f32 -1.442695, %v652_v58  ;;  %v1102_v62 = vmul.f32 -1.442695, %v651_v60 }
 0x17e   : > { %v592_v48 = vpop.xlane.xlu1 %591  ;;  %v589_v63 = vpop.xlane.xlu0 %588 }
 0x17f   : > { %1144 = vpow2.f32 %v1102_v62  ;;  %v653_v0 = vadd.f32 %v1548_v39, %v589_v63  ;;  %v654_v4 = vadd.f32 %v1543_v33, %v592_v48 }
 0x180   : > { %1146 = vpow2.f32 %v1103_v61 }
 0x181   : > { %v1137_v1 = vpop.eup %1136  ;;  %v1104_v5 = vmul.f32 -1.442695, %v653_v0  ;;  %v1105_v11 = vmul.f32 -1.442695, %v654_v4 }
 0x182   : > { %v1139_v2 = vpop.eup %1138  ;;  %v744_v3 = vadd.f32 1.0, %v1137_v1  ;;  %v598_v6 = vpop.xlane.xlu1 %597 }
 0x183   : > { %v743_v7 = vadd.f32 1.0, %v1139_v2  ;;  %v656_v8 = vadd.f32 %v1555_v45, %v598_v6  ;;  %v595_v9 = vpop.xlane.xlu0 %594 }
 0x184   : > { %1148 = vrcp.f32 %v744_v3  ;;  %v655_v17 = vadd.f32 %v1560_v47, %v595_v9 }
 0x185   : > { %v1141_v10 = vpop.eup %1140  ;;  %1150 = vrcp.f32 %v743_v7  ;;  %v1107_v12 = vmul.f32 -1.442695, %v656_v8 }
 0x186   : > { %v1143_v13 = vpop.eup %1142  ;;  %1152 = vpow2.f32 %v1104_v5  ;;  %v604_v14 = vpop.xlane.xlu1 %603  ;;  %v746_v19 = vadd.f32 1.0, %v1141_v10  ;;  %v1106_v21 = vmul.f32 -1.442695, %v655_v17 }
 0x187   : > { %v745_v15 = vadd.f32 1.0, %v1143_v13  ;;  %1154 = vpow2.f32 %v1107_v12  ;;  %v658_v16 = vadd.f32 %v1567_v54, %v604_v14  ;;  %v601_v18 = vpop.xlane.xlu0 %600 }
 0x188   : > { %v657_v25 = vadd.f32 %v1572_v40, %v601_v18 }
 0x189   : > { %1156 = vrcp.f32 %v745_v15  ;;  %v1109_v20 = vmul.f32 -1.442695, %v658_v16  ;;  %v1145_v23 = vpop.eup %1144 }
 0x18a   : > { %1158 = vpow2.f32 %v1105_v11  ;;  %v610_v24 = vpop.xlane.xlu1 %609  ;;  %v1147_v22 = vpop.eup %1146  ;;  %v747_v30 = vadd.f32 1.0, %v1145_v23  ;;  %v1108_v37 = vmul.f32 -1.442695, %v657_v25 }
 0x18b   : > { %1160 = vpow2.f32 %v1109_v20  ;;  %v660_v26 = vadd.f32 %v1543_v33, %v610_v24  ;;  %v607_v27 = vpop.xlane.xlu0 %606  ;;  %v748_v34 = vadd.f32 1.0, %v1147_v22 }
 0x18c   : > { %1162 = vrcp.f32 %v746_v19  ;;  %v659_v28 = vadd.f32 %v1548_v39, %v607_v27 }
 0x18d   : > { %v1111_v31 = vmul.f32 -1.442695, %v660_v26 }
 0x18e   : > { %v1149_v32 = vpop.eup %1148  ;;  %v616_v36 = vpop.xlane.xlu1 %615  ;;  %v1110_v46 = vmul.f32 -1.442695, %v659_v28 }
 0x18f   : > { %v1151_v29 = vpop.eup %1150  ;;  %1164 = vpow2.f32 %v1111_v31  ;;  %v662_v35 = vadd.f32 %v1555_v45, %v616_v36  ;;  %v613_v38 = vpop.xlane.xlu0 %612  ;;  %822 = vperm.xlu1 %1135, %v1149_v32  }
 0x190   : > { %v1153_v41 = vpop.eup %1152  ;;  %1166 = vpow2.f32 %v1106_v21  ;;  %817 = vperm.xlu0 %1134, %v1151_v29   ;;  %v661_v49 = vadd.f32 %v1560_v47, %v613_v38 }
 0x191   : > { %v1155_v42 = vpop.eup %1154  ;;  %1168 = vrcp.f32 %v747_v30  ;;  %v1113_v43 = vmul.f32 -1.442695, %v662_v35  ;;  %v749_v52 = vadd.f32 1.0, %v1153_v41 }
 0x192   : > { %1170 = vrcp.f32 %v748_v34  ;;  %v752_v44 = vadd.f32 1.0, %v1155_v42  ;;  %v622_v50 = vpop.xlane.xlu1 %621  ;;  %v1112_v60 = vmul.f32 -1.442695, %v661_v49 }
 0x193   : > { %v1157_v51 = vpop.eup %1156  ;;  %1172 = vpow2.f32 %v1108_v37  ;;  %v664_v53 = vadd.f32 %v1567_v54, %v622_v50  ;;  %v619_v55 = vpop.xlane.xlu0 %618 }
 0x194   : > { %v1159_v56 = vpop.eup %1158  ;;  %1174 = vrcp.f32 %v752_v44  ;;  %827 = vperm.xlu1 %1135, %v1157_v51   ;;  %v663_v63 = vadd.f32 %v1572_v40, %v619_v55 }
 0x195   : > { %v1161_v57 = vpop.eup %1160  ;;  %1176 = vpow2.f32 %v1113_v43  ;;  %v1115_v58 = vmul.f32 -1.442695, %v664_v53  ;;  %v750_v48 = vadd.f32 1.0, %v1159_v56 }
 0x196   : > { %v754_v59 = vadd.f32 1.0, %v1161_v57  ;;  %1178 = vpow2.f32 %v1110_v46  ;;  %v628_v61 = vpop.xlane.xlu1 %627  ;;  %v1163_v62 = vpop.eup %1162  ;;  %v1114_v8 = vmul.f32 -1.442695, %v663_v63 }
 0x197   : > { %1180 = vrcp.f32 %v749_v52  ;;  %v666_v0 = vadd.f32 %v1543_v33, %v628_v61  ;;  %v625_v1 = vpop.xlane.xlu0 %624 }
 0x198   : > { %1182 = vrcp.f32 %v754_v59  ;;  %832 = vperm.xlu1 %1135, %v1163_v62   ;;  %v665_v9 = vadd.f32 %v1548_v39, %v625_v1 }
 0x199   : > { %v1165_v2 = vpop.eup %1164  ;;  %1184 = vpow2.f32 %v1115_v58  ;;  %v1117_v3 = vmul.f32 -1.442695, %v666_v0 }
 0x19a   : > { %v1167_v4 = vpop.eup %1166  ;;  %v756_v5 = vadd.f32 1.0, %v1165_v2  ;;  %1186 = vpow2.f32 %v1112_v60  ;;  %v634_v6 = vpop.xlane.xlu1 %633  ;;  %v1116_v17 = vmul.f32 -1.442695, %v665_v9 }
 0x19b   : > { %v1169_v7 = vpop.eup %1168  ;;  %1188 = vrcp.f32 %v750_v48  ;;  %v668_v10 = vadd.f32 %v1555_v45, %v634_v6  ;;  %v631_v12 = vpop.xlane.xlu0 %630  ;;  %v751_v11 = vadd.f32 1.0, %v1167_v4 }
 0x19c   : > { %v1171_v13 = vpop.eup %1170  ;;  %1190 = vrcp.f32 %v756_v5  ;;  %837 = vperm.xlu1 %1135, %v1169_v7   ;;  %v667_v45 = vadd.f32 %v1560_v47, %v631_v12  ;;  %v1233_v5 = vld [vmem:[%s1343_s28 + $0x18] sm:$0xff] }
 0x19d   : > { %v1173_v33 = vpop.eup %1172  ;;  %1192 = vpow2.f32 %v1117_v3  ;;  %v1119_v14 = vmul.f32 -1.442695, %v668_v10  ;;  %v1232_v3 = vld [vmem:[%s1343_s28 + $0x10] sm:$0xff]  ;;  %v1235_v10 = vld [vmem:[%s1343_s28 + $0x8] sm:$0xff] }
 0x19e   : > { %v1175_v15 = vpop.eup %1174  ;;  %v640_v16 = vpop.xlane.xlu1 %639  ;;  %1194 = vpow2.f32 %v1114_v8  ;;  %v753_v24 = vadd.f32 1.0, %v1173_v33  ;;  %v1234_v8 = vld [vmem:[%s1343_s28] sm:$0xff] }
 0x19f   : > { %v1177_v18 = vpop.eup %1176  ;;  %v670_v19 = vadd.f32 %v1567_v54, %v640_v16  ;;  %862 = vperm.xlu0 %1134, %v1175_v15   ;;  %1196 = vpow2.f32 %v1119_v14  ;;  %v637_v25 = vpop.xlane.xlu0 %636  ;;  %v1118_v54 = vmul.f32 -1.442695, %v667_v45  ;;  %v1236_v33 = vld [vmem:[%s1343_s28 + $0x20] sm:$0xff]  ;;  %v1237_v14 = vld [vmem:[%s1343_s28 + $0x28] sm:$0xff] }
 0x1a0   : > { %v1179_v20 = vpop.eup %1178  ;;  %v758_v39 = vadd.f32 1.0, %v1177_v18  ;;  %842 = vperm.xlu1 %1135, %v1171_v13   ;;  %1198 = vrcp.f32 %v751_v11  ;;  %v669_v31 = vadd.f32 %v1572_v40, %v637_v25  ;;  %v1238_v18 = vld [vmem:[%s1343_s28 + $0x30] sm:$0xff]  ;;  %v1240_v45 = vld [vmem:[%s1343_s28 + $0x40] sm:$0xff] }
 0x1a1   : > { %v1181_v23 = vpop.eup %1180  ;;  %v1121_v22 = vmul.f32 -1.442695, %v670_v19  ;;  %v755_v47 = vadd.f32 1.0, %v1179_v20  ;;  %v1239_v19 = vld [vmem:[%s1343_s28 + $0x38] sm:$0xff] }
 0x1a2   : > { %v1183_v26 = vpop.eup %1182  ;;  %1200 = vrcp.f32 %v758_v39  ;;  %v1120_v37 = vmul.f32 -1.442695, %v669_v31  ;;  %v1244_v31 = vld [vmem:[%s1343_s28 + $0x50] sm:$0xff] }
 0x1a3   : > { %v1185_v27 = vpop.eup %1184  ;;  %1202 = vpow2.f32 %v1116_v17  ;;  %872 = vperm.xlu0 %1134, %v1183_v26  }
 0x1a4   : > { %v1187_v21 = vpop.eup %1186  ;;  %v760_v30 = vadd.f32 1.0, %v1185_v27  ;;  %1204 = vpow2.f32 %v1121_v22  ;;  %847 = vperm.xlu1 %1135, %v1181_v23   ;;  %v1242_v27 = vld [vmem:[%s1343_s28 + $0x90] sm:$0xff] }
 0x1a5   : > { %v1189_v32 = vpop.eup %1188  ;;  %1206 = vrcp.f32 %v753_v24  ;;  %v757_v36 = vadd.f32 1.0, %v1187_v21  ;;  %v1241_v24 = vld [vmem:[%s1343_s28 + $0x48] sm:$0xff] }
 0x1a6   : > { %v1191_v34 = vpop.eup %1190  ;;  %1208 = vrcp.f32 %v760_v30  ;;  %v1243_v30 = vld [vmem:[%s1343_s28 + $0x98] sm:$0xff] }
 0x1a7   : > { %v1193_v28 = vpop.eup %1192  ;;  %882 = vperm.xlu0 %1134, %v1191_v34   ;;  %1210 = vpow2.f32 %v1118_v54 }
 0x1a8   : > { %v762_v29 = vadd.f32 1.0, %v1193_v28  ;;  %852 = vperm.xlu1 %1135, %v1189_v32   ;;  %v1195_v35 = vpop.eup %1194  ;;  %1212 = vrcp.f32 %v755_v47  ;;  %v1245_v47 = vld [vmem:[%s1343_s28 + $0x58] sm:$0xff] }
 0x1a9   : > { %v1197_v38 = vpop.eup %1196  ;;  %v759_v43 = vadd.f32 1.0, %v1195_v35  ;;  %v1247_v35 = vld [vmem:[%s1343_s28 + $0xb8] sm:$0xff] }
 0x1aa   : > { %1214 = vrcp.f32 %v762_v29  ;;  %v1199_v41 = vpop.eup %1198  ;;  %v764_v40 = vadd.f32 1.0, %v1197_v38  ;;  %v1246_v29 = vld [vmem:[%s1343_s28 + $0xb0] sm:$0xff] }
 0x1ab   : > { %1216 = vrcp.f32 %v757_v36 }
 0x1ac   : > { %v1201_v42 = vpop.eup %1200  ;;  %1218 = vpow2.f32 %v1120_v37  ;;  %857 = vperm.xlu1 %1135, %v1199_v41   ;;  %v1248_v41 = vld [vmem:[%s1343_s28 + $0x60] sm:$0xff] }
 0x1ad   : > { %v1203_v44 = vpop.eup %1202  ;;  %1220 = vrcp.f32 %v764_v40  ;;  %892 = vperm.xlu0 %1134, %v1201_v42   ;;  %v1249_v42 = vld [vmem:[%s1343_s28 + $0x68] sm:$0xff] }
 0x1ae   : > { %v1205_v46 = vpop.eup %1204  ;;  %1222 = vrcp.f32 %v759_v43  ;;  %v761_v52 = vadd.f32 1.0, %v1203_v44 }
 0x1af   : > { %v1207_v49 = vpop.eup %1206  ;;  %v766_v50 = vadd.f32 1.0, %v1205_v46 }
 0x1b0   : > { %v1209_v51 = vpop.eup %1208  ;;  %867 = vperm.xlu1 %1135, %v1207_v49   ;;  %v1250_v49 = vld [vmem:[%s1343_s28 + $0xd0] sm:$0xff] }
 0x1b1   : > { %1224 = vrcp.f32 %v766_v50  ;;  %902 = vperm.xlu0 %1134, %v1209_v51   ;;  %v1211_v53 = vpop.eup %1210  ;;  %v1251_v51 = vld [vmem:[%s1343_s28 + $0xd8] sm:$0xff] }
 0x1b2   : > { %v1213_v55 = vpop.eup %1212  ;;  %1226 = vrcp.f32 %v761_v52  ;;  %v763_v58 = vadd.f32 1.0, %v1211_v53  ;;  %v1252_v53 = vld [vmem:[%s1343_s28 + $0x70] sm:$0xff] }
 0x1b4   : > { %v1215_v56 = vpop.eup %1214  ;;  %877 = vperm.xlu1 %1135, %v1213_v55   ;;  %1228 = vrcp.f32 %v763_v58 }
 0x1b5   : > { %v1217_v57 = vpop.eup %1216  ;;  %912 = vperm.xlu0 %1134, %v1215_v56   ;;  %v1253_v56 = vld [vmem:[%s1343_s28 + $0x78] sm:$0xff] }
 0x1b6   : > { %v1219_v59 = vpop.eup %1218 }
 0x1b7   : > { %v1221_v60 = vpop.eup %1220  ;;  %v765_v61 = vadd.f32 1.0, %v1219_v59  ;;  %v1254_v59 = vld [vmem:[%s1343_s28 + $0x80] sm:$0xff] }
 0x1b8   : > { %887 = vperm.xlu1 %1135, %v1217_v57   ;;  %v1223_v62 = vpop.eup %1222 }
 0x1b9   : > { %922 = vperm.xlu0 %1134, %v1221_v60   ;;  %1230 = vrcp.f32 %v765_v61  ;;  %v1255_v61 = vld [vmem:[%s1343_s28 + $0x88] sm:$0xff] }
 0x1bb   : > { %v1225_v48 = vpop.eup %1224 }
 0x1bc   : > { %897 = vperm.xlu1 %1135, %v1223_v62   ;;  %v1227_v63 = vpop.eup %1226 }
 0x1bd   : > { %932 = vperm.xlu0 %1134, %v1225_v48  }
 0x1be   : > { %v1229_v0 = vpop.eup %1228 }
 0x1c0   : > { %907 = vperm.xlu1 %1135, %v1227_v63   ;;  %v1256_v63 = vld [vmem:[%s1343_s28 + $0xf0] sm:$0xff] }
 0x1c3   : > { %v1231_v1 = vpop.eup %1230 }
 0x1c4   : > { %917 = vperm.xlu1 %1135, %v1229_v0  }
 0x1c8   : > { %927 = vperm.xlu1 %1135, %v1231_v1   ;;  %v1257_v1 = vld [vmem:[%s1343_s28 + $0xf8] sm:$0xff] }
 0x20e   : > { %v823_v2 = vpop.permute.xlu1 %822 }
 0x20f   : > { %v937_v4 = vmul.f32 %v1232_v3, %v823_v2  ;;  %v938_v6 = vmul.f32 %v1233_v5, %v823_v2  ;;  %v818_v7 = vpop.permute.xlu0 %817 }
 0x210   : > { %v935_v9 = vmul.f32 %v1234_v8, %v818_v7  ;;  %v936_v12 = vmul.f32 %v1235_v10, %v818_v7 }
 0x211   : > { %985 = vst [vmem:[%s1599_s27 + $0x10] sm:$0xff] %v937_v4  ;;  %986 = vst [vmem:[%s1599_s27 + $0x18] sm:$0xff] %v938_v6  ;;  %v1258_v4 = vld [vmem:[%s1343_s28 + $0xa0] sm:$0xff]  ;;  %v1259_v6 = vld [vmem:[%s1343_s28 + $0xa8] sm:$0xff] }
 0x212   : > { %983 = vst [vmem:[%s1599_s27] sm:$0xff] %v935_v9  ;;  %984 = vst [vmem:[%s1599_s27 + $0x8] sm:$0xff] %v936_v12  ;;  %v1260_v9 = vld [vmem:[%s1343_s28 + $0x110] sm:$0xff]  ;;  %v1261_v12 = vld [vmem:[%s1343_s28 + $0x118] sm:$0xff] }
 0x213   : > { %v828_v13 = vpop.permute.xlu1 %827 }
 0x214   : > { %v939_v11 = vmul.f32 %v1236_v33, %v828_v13  ;;  %v940_v15 = vmul.f32 %v1237_v14, %v828_v13 }
 0x216   : > { %987 = vst [vmem:[%s1599_s27 + $0x20] sm:$0xff] %v939_v11  ;;  %988 = vst [vmem:[%s1599_s27 + $0x28] sm:$0xff] %v940_v15  ;;  %v1262_v11 = vld [vmem:[%s1343_s28 + $0xc0] sm:$0xff]  ;;  %v1263_v15 = vld [vmem:[%s1343_s28 + $0xc8] sm:$0xff] }
 0x217   : > { %v833_v16 = vpop.permute.xlu1 %832 }
 0x218   : > { %v941_v17 = vmul.f32 %v1238_v18, %v833_v16  ;;  %v942_v20 = vmul.f32 %v1239_v19, %v833_v16 }
 0x21a   : > { %989 = vst [vmem:[%s1599_s27 + $0x30] sm:$0xff] %v941_v17  ;;  %990 = vst [vmem:[%s1599_s27 + $0x38] sm:$0xff] %v942_v20  ;;  %v1264_v17 = vld [vmem:[%s1343_s28 + $0x130] sm:$0xff]  ;;  %v1265_v20 = vld [vmem:[%s1343_s28 + $0x138] sm:$0xff] }
 0x21b   : > { %v838_v39 = vpop.permute.xlu1 %837 }
 0x21c   : > { %v943_v23 = vmul.f32 %v1240_v45, %v838_v39  ;;  %v944_v22 = vmul.f32 %v1241_v24, %v838_v39 }
 0x21e   : > { %991 = vst [vmem:[%s1599_s27 + $0x40] sm:$0xff] %v943_v23  ;;  %992 = vst [vmem:[%s1599_s27 + $0x48] sm:$0xff] %v944_v22  ;;  %v863_v25 = vpop.permute.xlu0 %862  ;;  %v1266_v23 = vld [vmem:[%s1343_s28 + $0xe0] sm:$0xff]  ;;  %v1267_v22 = vld [vmem:[%s1343_s28 + $0xe8] sm:$0xff] }
 0x21f   : > { %v843_v26 = vpop.permute.xlu1 %842  ;;  %v953_v21 = vmul.f32 %v1242_v27, %v863_v25  ;;  %v954_v54 = vmul.f32 %v1243_v30, %v863_v25  ;;  %v1268_v27 = vld [vmem:[%s1343_s28 + $0x150] sm:$0xff]  ;;  %v1269_v30 = vld [vmem:[%s1343_s28 + $0x158] sm:$0xff] }
 0x220   : > { %v945_v32 = vmul.f32 %v1244_v31, %v843_v26  ;;  %v946_v34 = vmul.f32 %v1245_v47, %v843_v26 }
 0x221   : > { %1001 = vst [vmem:[%s1599_s27 + $0x90] sm:$0xff] %v953_v21  ;;  %1002 = vst [vmem:[%s1599_s27 + $0x98] sm:$0xff] %v954_v54 }
 0x222   : > { %993 = vst [vmem:[%s1599_s27 + $0x50] sm:$0xff] %v945_v32  ;;  %994 = vst [vmem:[%s1599_s27 + $0x58] sm:$0xff] %v946_v34  ;;  %v873_v28 = vpop.permute.xlu0 %872  ;;  %v1270_v32 = vld [vmem:[%s1343_s28 + $0x100] sm:$0xff]  ;;  %v1271_v34 = vld [vmem:[%s1343_s28 + $0x108] sm:$0xff] }
 0x223   : > { %v848_v36 = vpop.permute.xlu1 %847  ;;  %v957_v37 = vmul.f32 %v1246_v29, %v873_v28  ;;  %v958_v38 = vmul.f32 %v1247_v35, %v873_v28  ;;  %v1272_v29 = vld [vmem:[%s1343_s28 + $0x170] sm:$0xff]  ;;  %v1273_v35 = vld [vmem:[%s1343_s28 + $0x178] sm:$0xff] }
 0x224   : > { %v947_v40 = vmul.f32 %v1248_v41, %v848_v36  ;;  %v948_v43 = vmul.f32 %v1249_v42, %v848_v36 }
 0x225   : > { %1005 = vst [vmem:[%s1599_s27 + $0xb0] sm:$0xff] %v957_v37  ;;  %1006 = vst [vmem:[%s1599_s27 + $0xb8] sm:$0xff] %v958_v38 }
 0x226   : > { %995 = vst [vmem:[%s1599_s27 + $0x60] sm:$0xff] %v947_v40  ;;  %996 = vst [vmem:[%s1599_s27 + $0x68] sm:$0xff] %v948_v43  ;;  %v883_v44 = vpop.permute.xlu0 %882  ;;  %v1274_v40 = vld [vmem:[%s1343_s28 + $0x120] sm:$0xff]  ;;  %v1275_v43 = vld [vmem:[%s1343_s28 + $0x128] sm:$0xff] }
 0x227   : > { %v853_v46 = vpop.permute.xlu1 %852  ;;  %v961_v50 = vmul.f32 %v1250_v49, %v883_v44  ;;  %v962_v52 = vmul.f32 %v1251_v51, %v883_v44  ;;  %v1276_v49 = vld [vmem:[%s1343_s28 + $0x140] sm:$0xff]  ;;  %v1277_v51 = vld [vmem:[%s1343_s28 + $0x148] sm:$0xff] }
 0x228   : > { %v949_v55 = vmul.f32 %v1252_v53, %v853_v46  ;;  %v950_v57 = vmul.f32 %v1253_v56, %v853_v46 }
 0x229   : > { %1009 = vst [vmem:[%s1599_s27 + $0xd0] sm:$0xff] %v961_v50  ;;  %1010 = vst [vmem:[%s1599_s27 + $0xd8] sm:$0xff] %v962_v52 }
 0x22a   : > { %997 = vst [vmem:[%s1599_s27 + $0x70] sm:$0xff] %v949_v55  ;;  %998 = vst [vmem:[%s1599_s27 + $0x78] sm:$0xff] %v950_v57  ;;  %v1278_v55 = vld [vmem:[%s1343_s28 + $0x160] sm:$0xff]  ;;  %v1279_v57 = vld [vmem:[%s1343_s28 + $0x168] sm:$0xff] }
 0x22b   : > { %v858_v58 = vpop.permute.xlu1 %857 }
 0x22c   : > { %v951_v60 = vmul.f32 %v1254_v59, %v858_v58  ;;  %v952_v62 = vmul.f32 %v1255_v61, %v858_v58  ;;  %v893_v48 = vpop.permute.xlu0 %892 }
 0x22d   : > { %v965_v0 = vmul.f32 %v1256_v63, %v893_v48  ;;  %v966_v2 = vmul.f32 %v1257_v1, %v893_v48 }
 0x22e   : > { %999 = vst [vmem:[%s1599_s27 + $0x80] sm:$0xff] %v951_v60  ;;  %1000 = vst [vmem:[%s1599_s27 + $0x88] sm:$0xff] %v952_v62 }
 0x22f   : > { %1013 = vst [vmem:[%s1599_s27 + $0xf0] sm:$0xff] %v965_v0  ;;  %1014 = vst [vmem:[%s1599_s27 + $0xf8] sm:$0xff] %v966_v2  ;;  %v868_v3 = vpop.permute.xlu1 %867 }
 0x230   : > { %v955_v5 = vmul.f32 %v1258_v4, %v868_v3  ;;  %v956_v7 = vmul.f32 %v1259_v6, %v868_v3  ;;  %v903_v8 = vpop.permute.xlu0 %902 }
 0x231   : > { %v969_v10 = vmul.f32 %v1260_v9, %v903_v8  ;;  %v970_v13 = vmul.f32 %v1261_v12, %v903_v8 }
 0x232   : > { %1003 = vst [vmem:[%s1599_s27 + $0xa0] sm:$0xff] %v955_v5  ;;  %1004 = vst [vmem:[%s1599_s27 + $0xa8] sm:$0xff] %v956_v7 }
 0x233   : > { %1017 = vst [vmem:[%s1599_s27 + $0x110] sm:$0xff] %v969_v10  ;;  %1018 = vst [vmem:[%s1599_s27 + $0x118] sm:$0xff] %v970_v13  ;;  %v878_v33 = vpop.permute.xlu1 %877 }
 0x234   : > { %v959_v14 = vmul.f32 %v1262_v11, %v878_v33  ;;  %v960_v16 = vmul.f32 %v1263_v15, %v878_v33  ;;  %v913_v18 = vpop.permute.xlu0 %912 }
 0x235   : > { %v973_v19 = vmul.f32 %v1264_v17, %v913_v18  ;;  %v974_v39 = vmul.f32 %v1265_v20, %v913_v18 }
 0x236   : > { %1007 = vst [vmem:[%s1599_s27 + $0xc0] sm:$0xff] %v959_v14  ;;  %1008 = vst [vmem:[%s1599_s27 + $0xc8] sm:$0xff] %v960_v16 }
 0x237   : > { %1021 = vst [vmem:[%s1599_s27 + $0x130] sm:$0xff] %v973_v19  ;;  %1022 = vst [vmem:[%s1599_s27 + $0x138] sm:$0xff] %v974_v39  ;;  %v888_v45 = vpop.permute.xlu1 %887 }
 0x238   : > { %v963_v24 = vmul.f32 %v1266_v23, %v888_v45  ;;  %v964_v25 = vmul.f32 %v1267_v22, %v888_v45  ;;  %v923_v26 = vpop.permute.xlu0 %922 }
 0x239   : > { %v977_v21 = vmul.f32 %v1268_v27, %v923_v26  ;;  %v978_v54 = vmul.f32 %v1269_v30, %v923_v26 }
 0x23a   : > { %1011 = vst [vmem:[%s1599_s27 + $0xe0] sm:$0xff] %v963_v24  ;;  %1012 = vst [vmem:[%s1599_s27 + $0xe8] sm:$0xff] %v964_v25 }
 0x23b   : > { %1025 = vst [vmem:[%s1599_s27 + $0x150] sm:$0xff] %v977_v21  ;;  %1026 = vst [vmem:[%s1599_s27 + $0x158] sm:$0xff] %v978_v54  ;;  %v898_v31 = vpop.permute.xlu1 %897 }
 0x23c   : > { %v967_v47 = vmul.f32 %v1270_v32, %v898_v31  ;;  %v968_v28 = vmul.f32 %v1271_v34, %v898_v31  ;;  %v933_v36 = vpop.permute.xlu0 %932 }
 0x23d   : > { %v981_v37 = vmul.f32 %v1272_v29, %v933_v36  ;;  %v982_v38 = vmul.f32 %v1273_v35, %v933_v36 }
 0x23e   : > { %1015 = vst [vmem:[%s1599_s27 + $0x100] sm:$0xff] %v967_v47  ;;  %1016 = vst [vmem:[%s1599_s27 + $0x108] sm:$0xff] %v968_v28 }
 0x23f   : > { %1029 = vst [vmem:[%s1599_s27 + $0x170] sm:$0xff] %v981_v37  ;;  %1030 = vst [vmem:[%s1599_s27 + $0x178] sm:$0xff] %v982_v38  ;;  %v908_v41 = vpop.permute.xlu1 %907 }
 0x240   : > { %v971_v42 = vmul.f32 %v1274_v40, %v908_v41  ;;  %v972_v44 = vmul.f32 %v1275_v43, %v908_v41 }
 0x242   : > { %1019 = vst [vmem:[%s1599_s27 + $0x120] sm:$0xff] %v971_v42  ;;  %1020 = vst [vmem:[%s1599_s27 + $0x128] sm:$0xff] %v972_v44 }
 0x243   : > { %v918_v46 = vpop.permute.xlu1 %917 }
 0x244   : > { %v975_v50 = vmul.f32 %v1276_v49, %v918_v46  ;;  %v976_v52 = vmul.f32 %v1277_v51, %v918_v46 }
 0x246   : > { %1023 = vst [vmem:[%s1599_s27 + $0x140] sm:$0xff] %v975_v50  ;;  %1024 = vst [vmem:[%s1599_s27 + $0x148] sm:$0xff] %v976_v52 }
 0x247   : > { %v928_v53 = vpop.permute.xlu1 %927 }
 0x248   : > { %v979_v56 = vmul.f32 %v1278_v55, %v928_v53  ;;  %v980_v58 = vmul.f32 %v1279_v57, %v928_v53 }
 0x24a   : > { %1027 = vst [vmem:[%s1599_s27 + $0x160] sm:$0xff] %v979_v56  ;;  %1028 = vst [vmem:[%s1599_s27 + $0x168] sm:$0xff] %v980_v58 }
 0x24b PF: > { %s17_s23 = sadd.s32 1, %s1286_s23  }
 0x24c   : > { %p14_p4 = scmp.ge.s32.totalorder %s17_s23, 4  }
 0x24e   :  { %16 = sbr.rel (!%p14_p4) target bundleno = 2 (0x2), region = 74 }

</bundles_post_ra>
